<compile_context>
chip_gen: v6e
topology: v6e:2x2x1
jax: 0.10.0
libtpu: 0.0.40
codegen_flags: <defaults>
</compile_context>

<pallas_src>
import jax
import jax.numpy as jnp
from jax.experimental import pallas as pl
from jax.experimental.pallas import tpu as pltpu

NEG_SLOPE = 0.01


def _leaky_relu(x):
    return jnp.where(x >= 0, x, NEG_SLOPE * x)


def _net_cfe_kernel(x_ref, w1_ref, b1_ref, w2_ref, b2_ref, w3_ref, b3_ref, o_ref):
    # x_ref: (TB, 310) bf16; w1: (310, 256) bf16; w2: (256, 128); w3: (128, 64)
    # biases: (1, H) f32 broadcasting over the batch tile. Accumulate in f32.
    h = jnp.dot(x_ref[...], w1_ref[...], preferred_element_type=jnp.float32)
    h = _leaky_relu(h + b1_ref[...])
    h = jnp.dot(h.astype(w2_ref.dtype), w2_ref[...],
                preferred_element_type=jnp.float32)
    h = _leaky_relu(h + b2_ref[...])
    h = jnp.dot(h.astype(w3_ref.dtype), w3_ref[...],
                preferred_element_type=jnp.float32)
    h = _leaky_relu(h + b3_ref[...])
    o_ref[...] = h.astype(o_ref.dtype)


def _round_up(v, m):
    return ((v + m - 1) // m) * m


def net_cfe_forward(x, params, *, block_b=1024, compute_dtype=jnp.bfloat16):
    """Fused 3-layer MLP forward equivalent to Net_CFE.forward(x)."""
    w1, b1, w2, b2, w3, b3 = params
    B, d_in = x.shape
    h1 = w1.shape[1]
    h2 = w2.shape[1]
    d_out = w3.shape[1]

    # Streaming operands in bf16 (halved HBM traffic + bf16-native MXU path);
    # biases and accumulation stay f32.
    xc = x.astype(compute_dtype)
    w1c = w1.astype(compute_dtype)
    w2c = w2.astype(compute_dtype)
    w3c = w3.astype(compute_dtype)
    b1_2d = b1.reshape(1, h1).astype(jnp.float32)
    b2_2d = b2.reshape(1, h2).astype(jnp.float32)
    b3_2d = b3.reshape(1, d_out).astype(jnp.float32)

    # Batch tile: multiple of 8 sublanes, up to block_b rows. No host-side
    # padding: the last (partial) block is masked by Pallas, and rows past B
    # are never written to the output.
    tb = min(block_b, _round_up(max(B, 8), 8))
    if pl.cdiv(B, tb) < 2:
        # Aim for >=2 grid steps (uses both v7x TensorCores via the "parallel"
        # axis) whenever that still leaves >=256-row tiles.
        half = _round_up(pl.cdiv(B, 2), 8)
        if half >= 256:
            tb = half
    grid_b = pl.cdiv(B, tb)

    out = pl.pallas_call(
        _net_cfe_kernel,
        out_shape=jax.ShapeDtypeStruct((B, d_out), jnp.float32),
        grid_spec=pl.GridSpec(
            grid=(grid_b,),
            in_specs=[
                pl.BlockSpec((tb, d_in), lambda i: (i, 0)),    # x batch tile
                pl.BlockSpec((d_in, h1), lambda i: (0, 0)),    # W1 (full, resident)
                pl.BlockSpec((1, h1), lambda i: (0, 0)),       # b1
                pl.BlockSpec((h1, h2), lambda i: (0, 0)),      # W2
                pl.BlockSpec((1, h2), lambda i: (0, 0)),       # b2
                pl.BlockSpec((h2, d_out), lambda i: (0, 0)),   # W3
                pl.BlockSpec((1, d_out), lambda i: (0, 0)),    # b3
            ],
            out_specs=pl.BlockSpec((tb, d_out), lambda i: (i, 0)),
        ),
        compiler_params=pltpu.CompilerParams(
            dimension_semantics=("parallel",),
        ),
    )(xc, w1c, b1_2d, w2c, b2_2d, w3c, b3_2d)
    return out


if __name__ == "__main__":
    key = jax.random.PRNGKey(0)
    B, D_IN, H1, H2, D_OUT = 2, 310, 256, 128, 64
    keys = jax.random.split(key, 8)

    def init_linear(kw, kb, fan_in, fan_out):
        # Match nn.Linear's default U(-1/sqrt(fan_in), 1/sqrt(fan_in)) init;
        # weights stored directly in (in, out) layout (== W.T of PyTorch).
        bound = float(1.0 / (fan_in ** 0.5))
        w = jax.random.uniform(kw, (fan_in, fan_out), minval=-bound,
                               maxval=bound, dtype=jnp.float32)
        b = jax.random.uniform(kb, (fan_out,), minval=-bound,
                               maxval=bound, dtype=jnp.float32)
        return w, b

    w1, b1 = init_linear(keys[1], keys[2], D_IN, H1)
    w2, b2 = init_linear(keys[3], keys[4], H1, H2)
    w3, b3 = init_linear(keys[5], keys[6], H2, D_OUT)
    params = (w1, b1, w2, b2, w3, b3)

    # Pure-JAX f32 reference.
    def ref_fn(xx):
        h = jnp.dot(xx, w1) + b1
        h = jnp.where(h >= 0, h, NEG_SLOPE * h)
        h = jnp.dot(h, w2) + b2
        h = jnp.where(h >= 0, h, NEG_SLOPE * h)
        h = jnp.dot(h, w3) + b3
        h = jnp.where(h >= 0, h, NEG_SLOPE * h)
        return h

    # Primary small-shape check (B = 2).
    x = jax.random.normal(keys[0], (B, D_IN), dtype=jnp.float32)
    out = jax.block_until_ready(net_cfe_forward(x, params))
    ref = ref_fn(x)
    assert out.shape == (B, D_OUT), out.shape
    # bf16 streaming operands (f32 accumulation) -> looser tolerance vs f32 ref.
    assert jnp.allclose(out, ref, atol=5e-2, rtol=5e-2), (
        float(jnp.max(jnp.abs(out - ref))))

    # Secondary check: batch not a multiple of the 8-row sublane tile,
    # exercising the masked partial last block (no host-side padding copy).
    B2 = 37
    x2 = jax.random.normal(keys[7], (B2, D_IN), dtype=jnp.float32)
    out2 = jax.block_until_ready(net_cfe_forward(x2, params))
    ref2 = ref_fn(x2)
    assert out2.shape == (B2, D_OUT), out2.shape
    assert jnp.allclose(out2, ref2, atol=5e-2, rtol=5e-2), (
        float(jnp.max(jnp.abs(out2 - ref2))))

    print("KERNEL_OK")
</pallas_src>

<mosaic_0001>
module attributes {stable_mosaic.version = 11 : i64} {
  func.func @_net_cfe_kernel(%arg0: i32, %arg1: memref<8x310xbf16, #tpu.memory_space<vmem>>, %arg2: memref<310x256xbf16, #tpu.memory_space<vmem>>, %arg3: memref<1x256xf32, #tpu.memory_space<vmem>>, %arg4: memref<256x128xbf16, #tpu.memory_space<vmem>>, %arg5: memref<1x128xf32, #tpu.memory_space<vmem>>, %arg6: memref<128x64xbf16, #tpu.memory_space<vmem>>, %arg7: memref<1x64xf32, #tpu.memory_space<vmem>>, %arg8: memref<8x64xf32, #tpu.memory_space<vmem>>) attributes {dimension_semantics = [#tpu.dimension_semantics<parallel>], iteration_bounds = array<i64: 1>, scalar_prefetch = 0 : i64, scratch_operands = 0 : i64, tpu.core_type = #tpu.core_type<tc>, window_params = [{transform_indices = @transform_0, window_bounds = array<i64: 8, 310>}, {pipeline_mode = #tpu.pipeline_mode<synchronous>, transform_indices = @transform_1, window_bounds = array<i64: 310, 256>}, {pipeline_mode = #tpu.pipeline_mode<synchronous>, transform_indices = @transform_2, window_bounds = array<i64: 1, 256>}, {pipeline_mode = #tpu.pipeline_mode<synchronous>, transform_indices = @transform_3, window_bounds = array<i64: 256, 128>}, {pipeline_mode = #tpu.pipeline_mode<synchronous>, transform_indices = @transform_4, window_bounds = array<i64: 1, 128>}, {pipeline_mode = #tpu.pipeline_mode<synchronous>, transform_indices = @transform_5, window_bounds = array<i64: 128, 64>}, {pipeline_mode = #tpu.pipeline_mode<synchronous>, transform_indices = @transform_6, window_bounds = array<i64: 1, 64>}, {transform_indices = @transform_7, window_bounds = array<i64: 8, 64>}]} {
    %c0 = arith.constant 0 : index
    %c0_0 = arith.constant 0 : index
    %0 = vector.load %arg1[%c0, %c0_0] : memref<8x310xbf16, #tpu.memory_space<vmem>>, vector<8x310xbf16>
    %c0_1 = arith.constant 0 : index
    %c0_2 = arith.constant 0 : index
    %1 = vector.load %arg2[%c0_1, %c0_2] : memref<310x256xbf16, #tpu.memory_space<vmem>>, vector<310x256xbf16>
    %cst = arith.constant dense<0.000000e+00> : vector<8x256xf32>
    %2 = tpu.matmul %0, %1, %cst {dimension_numbers = #tpu.dot_dimension_numbers<[1], [0], [0], [1], [0, 0, 1, 1], [], []>} : vector<8x310xbf16>, vector<310x256xbf16>, vector<8x256xf32> -> vector<8x256xf32>
    %c0_3 = arith.constant 0 : index
    %c0_4 = arith.constant 0 : index
    %3 = vector.load %arg3[%c0_3, %c0_4] : memref<1x256xf32, #tpu.memory_space<vmem>>, vector<1x256xf32>
    %4 = vector.broadcast %3 : vector<1x256xf32> to vector<8x256xf32>
    %5 = arith.addf %2, %4 : vector<8x256xf32>
    %cst_5 = arith.constant 0.000000e+00 : f32
    %6 = vector.broadcast %cst_5 : f32 to vector<8x256xf32>
    %7 = arith.cmpf oge, %5, %6 : vector<8x256xf32>
    %cst_6 = arith.constant 0.00999999977 : f32
    %8 = vector.broadcast %cst_6 : f32 to vector<8x256xf32>
    %9 = arith.mulf %8, %5 : vector<8x256xf32>
    %10 = arith.select %7, %5, %9 : vector<8x256xi1>, vector<8x256xf32>
    %11 = arith.truncf %10 : vector<8x256xf32> to vector<8x256xbf16>
    %c0_7 = arith.constant 0 : index
    %c0_8 = arith.constant 0 : index
    %12 = vector.load %arg4[%c0_7, %c0_8] : memref<256x128xbf16, #tpu.memory_space<vmem>>, vector<256x128xbf16>
    %cst_9 = arith.constant dense<0.000000e+00> : vector<8x128xf32>
    %13 = tpu.matmul %11, %12, %cst_9 {dimension_numbers = #tpu.dot_dimension_numbers<[1], [0], [0], [1], [0, 0, 1, 1], [], []>} : vector<8x256xbf16>, vector<256x128xbf16>, vector<8x128xf32> -> vector<8x128xf32>
    %c0_10 = arith.constant 0 : index
    %c0_11 = arith.constant 0 : index
    %14 = vector.load %arg5[%c0_10, %c0_11] : memref<1x128xf32, #tpu.memory_space<vmem>>, vector<1x128xf32>
    %15 = vector.broadcast %14 : vector<1x128xf32> to vector<8x128xf32>
    %16 = arith.addf %13, %15 : vector<8x128xf32>
    %cst_12 = arith.constant 0.000000e+00 : f32
    %17 = vector.broadcast %cst_12 : f32 to vector<8x128xf32>
    %18 = arith.cmpf oge, %16, %17 : vector<8x128xf32>
    %cst_13 = arith.constant 0.00999999977 : f32
    %19 = vector.broadcast %cst_13 : f32 to vector<8x128xf32>
    %20 = arith.mulf %19, %16 : vector<8x128xf32>
    %21 = arith.select %18, %16, %20 : vector<8x128xi1>, vector<8x128xf32>
    %22 = arith.truncf %21 : vector<8x128xf32> to vector<8x128xbf16>
    %c0_14 = arith.constant 0 : index
    %c0_15 = arith.constant 0 : index
    %23 = vector.load %arg6[%c0_14, %c0_15] : memref<128x64xbf16, #tpu.memory_space<vmem>>, vector<128x64xbf16>
    %cst_16 = arith.constant dense<0.000000e+00> : vector<8x64xf32>
    %24 = tpu.matmul %22, %23, %cst_16 {dimension_numbers = #tpu.dot_dimension_numbers<[1], [0], [0], [1], [0, 0, 1, 1], [], []>} : vector<8x128xbf16>, vector<128x64xbf16>, vector<8x64xf32> -> vector<8x64xf32>
    %c0_17 = arith.constant 0 : index
    %c0_18 = arith.constant 0 : index
    %25 = vector.load %arg7[%c0_17, %c0_18] : memref<1x64xf32, #tpu.memory_space<vmem>>, vector<1x64xf32>
    %26 = vector.broadcast %25 : vector<1x64xf32> to vector<8x64xf32>
    %27 = arith.addf %24, %26 : vector<8x64xf32>
    %cst_19 = arith.constant 0.000000e+00 : f32
    %28 = vector.broadcast %cst_19 : f32 to vector<8x64xf32>
    %29 = arith.cmpf oge, %27, %28 : vector<8x64xf32>
    %cst_20 = arith.constant 0.00999999977 : f32
    %30 = vector.broadcast %cst_20 : f32 to vector<8x64xf32>
    %31 = arith.mulf %30, %27 : vector<8x64xf32>
    %32 = arith.select %29, %27, %31 : vector<8x64xi1>, vector<8x64xf32>
    %c0_21 = arith.constant 0 : index
    %c0_22 = arith.constant 0 : index
    %33 = vector.load %arg8[%c0_21, %c0_22] : memref<8x64xf32, #tpu.memory_space<vmem>>, vector<8x64xf32>
    tpu.vector_store %arg8[%c0_21, %c0_22], %32 {strides = array<i32>} : memref<8x64xf32, #tpu.memory_space<vmem>>, vector<8x64xf32>,
    return
  }
  func.func @transform_0(%arg0: i32) -> (i32, i32) {
    %c0_i32 = arith.constant 0 : i32
    %c0_i32_0 = arith.constant 0 : i32
    return %arg0, %c0_i32 : i32, i32
  }
  func.func @transform_1(%arg0: i32) -> (i32, i32) {
    %c0_i32 = arith.constant 0 : i32
    %c0_i32_0 = arith.constant 0 : i32
    %c0_i32_1 = arith.constant 0 : i32
    return %c0_i32, %c0_i32_0 : i32, i32
  }
  func.func @transform_2(%arg0: i32) -> (i32, i32) {
    %c0_i32 = arith.constant 0 : i32
    %c0_i32_0 = arith.constant 0 : i32
    %c0_i32_1 = arith.constant 0 : i32
    return %c0_i32, %c0_i32_0 : i32, i32
  }
  func.func @transform_3(%arg0: i32) -> (i32, i32) {
    %c0_i32 = arith.constant 0 : i32
    %c0_i32_0 = arith.constant 0 : i32
    %c0_i32_1 = arith.constant 0 : i32
    return %c0_i32, %c0_i32_0 : i32, i32
  }
  func.func @transform_4(%arg0: i32) -> (i32, i32) {
    %c0_i32 = arith.constant 0 : i32
    %c0_i32_0 = arith.constant 0 : i32
    %c0_i32_1 = arith.constant 0 : i32
    return %c0_i32, %c0_i32_0 : i32, i32
  }
  func.func @transform_5(%arg0: i32) -> (i32, i32) {
    %c0_i32 = arith.constant 0 : i32
    %c0_i32_0 = arith.constant 0 : i32
    %c0_i32_1 = arith.constant 0 : i32
    return %c0_i32, %c0_i32_0 : i32, i32
  }
  func.func @transform_6(%arg0: i32) -> (i32, i32) {
    %c0_i32 = arith.constant 0 : i32
    %c0_i32_0 = arith.constant 0 : i32
    %c0_i32_1 = arith.constant 0 : i32
    return %c0_i32, %c0_i32_0 : i32, i32
  }
  func.func @transform_7(%arg0: i32) -> (i32, i32) {
    %c0_i32 = arith.constant 0 : i32
    %c0_i32_0 = arith.constant 0 : i32
    return %arg0, %c0_i32 : i32, i32
  }
}

</mosaic_0001>

<bundles_post_ra>
// kernel: tpu_custom_call.1
= control target key start
LH: loop header
LB: loop body
LE: loop exit
PB: predicated region body
PF: predicated region fallthrough
CT: control target
= control target key end

     0   :  { %12 = vsyncpa [#allocation3], 0  ;;  %s1152_s0 = inlined_call_operand.vmem [shape: bf16[2,310], index: 0, kind: input, shape index: {}]   ;;  %s1153_s1 = inlined_call_operand.hbm [shape: bf16[310,256], index: 1, kind: input, shape index: {}]   ;;  %s1154_s2 = inlined_call_operand.vmem [shape: f32[1,256], index: 2, kind: input, shape index: {}]   ;;  %s1155_s3 = inlined_call_operand.hbm [shape: bf16[256,128], index: 3, kind: input, shape index: {}]   ;;  %s1156_s4 = inlined_call_operand.vmem [shape: f32[1,128], index: 4, kind: input, shape index: {}]   ;;  %s1157_s5 = inlined_call_operand.vmem [shape: bf16[128,64], index: 5, kind: input, shape index: {}]   ;;  %s1158_s6 = inlined_call_operand.vmem [shape: f32[1,64], index: 6, kind: input, shape index: {}]   ;;  %s1159_s7 = inlined_call_operand.hbm [shape: f32[2,64], index: 7, kind: output, shape index: {}]  }
   0x1   :  { %13 = vsyncpa [#allocation6], 0 }
   0x2   :  { %14 = vsyncpa [#allocation4], 0  ;;  %s1040_s24 = smov [#allocation2]  }
   0x3   :  { %s22_s25 = sshll.u32 %s1040_s24, 4  ;;  %s23_s25 = int_to_ptr.vmem [resolvable:$true] %s22_s25 }
   0x4   :  { %s982_s26 = scalar_lea.vmem %s23_s25, 4992  ;;  %p987_p1 = scmp.lt.s32.totalorder %s23_s25, %s23_s25 }
   0x5   :  { %p983_p0 = scmp.ne.s32.totalorder %s23_s25, %s982_s26  ;;  %p988_p2 = scmp.lt.s32.totalorder %s982_s26, %s982_s26 }
   0x7   :  { %p989_p3 = por %p988_p2, %p987_p1 }
   0x9   :  { %p990_p4 = pnand %p989_p3, %p983_p0 }
   0xb   :  { %993 = shalt.err (!%p990_p4)
}
   0xc   :  { %s1041_s27 = smov 128   ;;  %s1042_s28 = smov 8  }
   0xd   :  { %28 = dma.hbm_to_vmem [thread:$0]  %s1153_s1, 4992, %s23_s25, [#allocation3], %s1041_s27, %s1041_s27, %s1042_s28  }
   0xe   :  { %s1043_s8 = smov [#allocation5]  }
   0xf   :  { %s36_s9 = sshll.u32 %s1043_s8, 4  ;;  %s37_s9 = int_to_ptr.vmem [resolvable:$true] %s36_s9 }
  0x10   :  { %s1002_s10 = scalar_lea.vmem %s37_s9, 2048  ;;  %p1007_p6 = scmp.lt.s32.totalorder %s37_s9, %s37_s9 }
  0x11   :  { %p1003_p5 = scmp.ne.s32.totalorder %s37_s9, %s1002_s10  ;;  %p1008_p7 = scmp.lt.s32.totalorder %s1002_s10, %s1002_s10 }
  0x13   :  { %p1009_p8 = por %p1008_p7, %p1007_p6 }
  0x15   :  { %p1010_p9 = pnand %p1009_p8, %p1003_p5 }
  0x17   :  { %1013 = shalt.err (!%p1010_p9)
}
  0x18   :  { %s1044_s11 = smov 64   ;;  %s1045_s12 = smov 4  }
  0x19   :  { %42 = dma.hbm_to_vmem [thread:$0]  %s1155_s3, 2048, %s37_s9, [#allocation6], %s1044_s11, %s1044_s11, %s1045_s12  }
  0x1a   :  { %1034 = dma.done.wait [#allocation3], 4992  }
  0x1b   :  { %1035 = vsyncadd [#allocation3], 4294962304 }
  0x1c   :  { %1036 = dma.done.wait [#allocation6], 2048  }
  0x1d   :  { %1037 = vsyncadd [#allocation6], 4294965248  ;;  %v1046_v0 = vmov 0   ;;  %v891_v1 = vld [vmem:[#allocation2 + $0x74] ss:$8 sps:$4 sm:$0xff]   ;;  %vm349_vm0 = vcmask 1042432   ;;  %v101_v15 = vlaneseq }
  0x1e   :  { %429 = vmatprep.mubr.bf16.mxu1 %v1046_v0  ;;  %v893_v2 = vld [vmem:[#allocation2 + $0x70] ss:$8 sps:$4 sm:$0xff]   ;;  %356 = vmatprep.subr.bf16.mxu0 %v891_v1  ;;  %v894_v3 = vld [vmem:[#allocation2 + $0x64] ss:$8 sps:$4 sm:$0xff]   ;;  %v896_v4 = vld [vmem:[#allocation2 + $0x60] ss:$8 sps:$4 sm:$0xff]  }
  0x1f   :  { %357 = vmatpush1.bf16.msra.mxu0 %v893_v2  ;;  %v897_v5 = vld [vmem:[#allocation2 + $0x54] ss:$8 sps:$4 sm:$0xff]   ;;  %v899_v6 = vld [vmem:[#allocation2 + $0x50] ss:$8 sps:$4 sm:$0xff]   ;;  %v900_v7 = vld [vmem:[#allocation2 + $0x44] ss:$8 sps:$4 sm:$0xff]  }
  0x20   :  { %358 = vmatprep.subr.bf16.mxu0 %v894_v3  ;;  %v902_v8 = vld [vmem:[#allocation2 + $0x40] ss:$8 sps:$4 sm:$0xff]   ;;  %v903_v9 = vld [vmem:[#allocation2 + $0x34] ss:$8 sps:$4 sm:$0xff]   ;;  %v905_v10 = vld [vmem:[#allocation2 + $0x30] ss:$8 sps:$4 sm:$0xff]  }
  0x21   :  { %v98_v11 = vld [vmem:[#allocation2 + $0x130] sm:$0x77]  ;;  %v906_v12 = vld [vmem:[#allocation2 + $0x24] ss:$8 sps:$4 sm:$0xff]   ;;  %v1047_v16 = vmov 1966171168  }
  0x22   :  { %v798_v13 = vcombine.high %v98_v11, %v98_v11  ;;  %v797_v14 = vcombine.low %v98_v11, %v98_v11  ;;  %v118_v17 = vunpack.c.l.s4 %v1047_v16  ;;  %v908_v18 = vld [vmem:[#allocation2 + $0x20] ss:$8 sps:$4 sm:$0xff]   ;;  %v931_v20 = vld [vmem:[#allocation2 + $0x124] ss:$8 sps:$4 sm:$0xff]   ;;  %v909_v21 = vld [vmem:[#allocation2 + $0x14] ss:$8 sps:$4 sm:$0xff]  }
  0x23   :  { %359 = vmatpush1.bf16.msra.mxu0 %v896_v4  ;;  %v934_v22 = vld [vmem:[#allocation2 + $0x120] ss:$8 sps:$4 sm:$0xff]   ;;  %v937_v23 = vld [vmem:[#allocation2 + $0x114] ss:$8 sps:$4 sm:$0xff]   ;;  %v1099_v24 = vshrl.u32 %v101_v15, 7  ;;  %vm345_vm1 = vcmask 441344  }
  0x24   :  { %360 = vmatprep.subr.bf16.mxu0 %v897_v5  ;;  %799 = vmatprep.subr.msk.bf16.mxu1 %vm349_vm0, %v798_v13  ;;  %v351_v19 = vsel %vm349_vm0, %v797_v14, 0  ;;  %v119_v25 = vunpack.c.0.s8 %v118_v17  ;;  %v911_v26 = vld [vmem:[#allocation2 + $0x10] ss:$8 sps:$4 sm:$0xff]   ;;  %v912_v27 = vld [vmem:[#allocation2 + $0x4] ss:$8 sps:$4 sm:$0xff]   ;;  %v1048_v14 = vmov 0.0  }
  0x25   :  { %406 = vmatpush1.bf16.msra.mxu1 %v351_v19  ;;  %v940_v28 = vld [vmem:[#allocation2 + $0x110] ss:$8 sps:$4 sm:$0xff]   ;;  %v943_v29 = vld [vmem:[#allocation2 + $0x104] ss:$8 sps:$4 sm:$0xff]   ;;  %v914_v31 = vld [vmem:[#allocation2] ss:$8 sps:$4 sm:$0xff]  }
  0x26   :  { %407 = vmatprep.subr.bf16.mxu1 %v931_v20  ;;  %v122_v30 = vsub.s32 %v119_v25, %v1099_v24  ;;  %v56_v32 = vld [vmem:[%s1152_s0] sm:$0x7]  ;;  %v57_v33 = vld [vmem:[%s1152_s0 + $0x3] sm:$0x7]  ;;  %v915_v34 = vld [vmem:[#allocation2 + $0xf4] ss:$8 sps:$4 sm:$0xff]  }
  0x27   :  { %361 = vmatpush1.bf16.msra.mxu0 %v899_v6  ;;  %v58_v35 = vld [vmem:[%s1152_s0 + $0x6] sm:$0x7]  ;;  %v59_v36 = vld [vmem:[%s1152_s0 + $0x9] sm:$0x7]  ;;  %v115_v37 = vcombine.low %v56_v32, %v57_v33  ;;  %v950_v41 = vld [vmem:[#allocation5 + $0x78] sm:$0xff]   ;;  %v103_v19 = vsub.s32 0, %v1099_v24 }
  0x28   :  { %362 = vmatprep.subr.bf16.mxu0 %v900_v7  ;;  %v946_v38 = vld [vmem:[#allocation2 + $0x100] ss:$8 sps:$4 sm:$0xff]   ;;  %v116_v39 = vcombine.low %v58_v35, %v59_v36  ;;  %v917_v43 = vld [vmem:[#allocation2 + $0xf0] ss:$8 sps:$4 sm:$0xff]   ;;  %v918_v46 = vld [vmem:[#allocation2 + $0xe4] ss:$8 sps:$4 sm:$0xff]  }
  0x29   :  { %408 = vmatpush1.bf16.msra.mxu1 %v934_v22  ;;  %v123_v40 = vrot.slane %v115_v37, %v122_v30  ;;  %v920_v47 = vld [vmem:[#allocation2 + $0xe0] ss:$8 sps:$4 sm:$0xff]   ;;  %v951_v50 = vld [vmem:[#allocation5 + $0x38] sm:$0xff]   ;;  %v924_v57 = vld [vmem:[#allocation2 + $0xc4] ss:$8 sps:$4 sm:$0xff]   ;;  %vm1049_vm4 = vmmov 0  }
  0x2a   :  { %409 = vmatprep.subr.bf16.mxu1 %v937_v23  ;;  %v130_v42 = vrot.slane %v116_v39, %v122_v30  ;;  %v921_v51 = vld [vmem:[#allocation2 + $0xd4] ss:$8 sps:$4 sm:$0xff]   ;;  %v952_v52 = vld [vmem:[#allocation5 + $0x70] sm:$0xff]   ;;  %v923_v55 = vld [vmem:[#allocation2 + $0xd0] ss:$8 sps:$4 sm:$0xff]   ;;  %vm739_vm7 = vcmask 523264  }
  0x2b   :  { %363 = vmatpush1.bf16.msra.mxu0 %v902_v8  ;;  %v953_v54 = vld [vmem:[#allocation5 + $0x30] sm:$0xff]   ;;  %v954_v56 = vld [vmem:[#allocation5 + $0x68] sm:$0xff]   ;;  %v956_v60 = vld [vmem:[#allocation5 + $0x60] sm:$0xff]  }
  0x2c   :  { %364 = vmatprep.subr.bf16.mxu0 %v903_v9  ;;  %v131_v44 = vcombine.low %v123_v40, %v130_v42  ;;  %v132_v45 = vcombine.high %v123_v40, %v130_v42  ;;  %v955_v58 = vld [vmem:[#allocation5 + $0x28] sm:$0xff]   ;;  %v929_v61 = vld [vmem:[#allocation2 + $0xb4] ss:$8 sps:$4 sm:$0xff]   ;;  %v933_v63 = vld [vmem:[#allocation2 + $0xb0] ss:$8 sps:$4 sm:$0xff]  }
  0x2d   :  { %410 = vmatpush1.bf16.msra.mxu1 %v940_v28  ;;  %v927_v59 = vld [vmem:[#allocation2 + $0xc0] ss:$8 sps:$4 sm:$0xff]   ;;  %v957_v62 = vld [vmem:[#allocation5 + $0x20] sm:$0xff]   ;;  %v935_v0 = vld [vmem:[#allocation2 + $0xa4] ss:$8 sps:$4 sm:$0xff]  }
  0x2e   :  { %411 = vmatprep.subr.bf16.mxu1 %v943_v29  ;;  %v139_v48 = vrot.slane %v131_v44, %v122_v30  ;;  %v146_v49 = vrot.slane %v132_v45, %v122_v30  ;;  %v939_v1 = vld [vmem:[#allocation2 + $0xa0] ss:$8 sps:$4 sm:$0xff]   ;;  %v941_v2 = vld [vmem:[#allocation2 + $0x94] ss:$8 sps:$4 sm:$0xff]   ;;  %v945_v3 = vld [vmem:[#allocation2 + $0x90] ss:$8 sps:$4 sm:$0xff]  }
  0x2f   :  { %365 = vmatpush1.bf16.msra.mxu0 %v905_v10  ;;  %v947_v4 = vld [vmem:[#allocation2 + $0x84] ss:$8 sps:$4 sm:$0xff]   ;;  %v949_v5 = vld [vmem:[#allocation2 + $0x80] ss:$8 sps:$4 sm:$0xff]   ;;  %v958_v6 = vld [vmem:[#allocation5 + $0x58] sm:$0xff]  }
  0x30   :  { %366 = vmatprep.subr.bf16.mxu0 %v906_v12  ;;  %v147_v53 = vcombine.high %v139_v48, %v139_v48  ;;  %388 = vmatprep.mubr.bf16.mxu0 %v146_v49  ;;  %v959_v7 = vld [vmem:[#allocation5 + $0x18] sm:$0xff]   ;;  %v960_v8 = vld [vmem:[#allocation5 + $0x50] sm:$0xff]   ;;  %v962_v10 = vld [vmem:[#allocation5 + $0x48] sm:$0xff]  }
  0x31   :  { %412 = vmatpush1.bf16.msra.mxu1 %v946_v38  ;;  %v961_v9 = vld [vmem:[#allocation5 + $0x10] sm:$0xff]   ;;  %v963_v11 = vld [vmem:[#allocation5 + $0x8] sm:$0xff]   ;;  %v964_v12 = vld [vmem:[#allocation5 + $0x40] sm:$0xff]  }
  0x32   :  { %827 = vmatprep.subr.bf16.mxu1 %v950_v41  ;;  %v965_v13 = vld [vmem:[#allocation5] sm:$0xff]   ;;  %v99_v20 = vld [vmem:[%s1154_s2] sm:$0x3]  ;;  %v967_v39 = vld [vmem:[%s1157_s5 + $0x30] sm:$0xff]  }
  0x33   :  { %367 = vmatpush1.bf16.msra.mxu0 %v908_v18  ;;  %v104_v22 = vrot.slane %v99_v20, %v103_v19  ;;  %v968_v40 = vld [vmem:[%s1157_s5 + $0x28] sm:$0xff]   ;;  %v969_v41 = vld [vmem:[%s1157_s5 + $0x20] sm:$0xff]   ;;  %v970_v42 = vld [vmem:[%s1157_s5 + $0x18] sm:$0xff]  }
  0x34   :  { %368 = vmatprep.subr.bf16.mxu0 %v909_v21  ;;  %800 = vmatmul.mubr.msk.bf16.vlgmr.msra.gmra.mxu1 %vm345_vm1, %v147_v53  ;;  %v107_v21 = vsub.s32 1, %v1099_v24  ;;  %v966_v24 = vld [vmem:[%s1157_s5 + $0x38] sm:$0xff]   ;;  %v972_v44 = vld [vmem:[%s1157_s5 + $0x8] sm:$0xff]   ;;  %v973_v45 = vld [vmem:[%s1157_s5] sm:$0xff]  }
  0x35   :  { %828 = vmatpush3.bf16.msra.mxu1 %v951_v50 }
  0x36   :  { %829 = vmatprep.subr.bf16.mxu1 %v952_v52  ;;  %v108_v23 = vrot.slane %v99_v20, %v107_v21 }
  0x37   :  { %369 = vmatpush1.bf16.msra.mxu0 %v911_v26 }
  0x38   :  { %370 = vmatprep.subr.bf16.mxu0 %v912_v27 }
  0x39   :  { %830 = vmatpush3.bf16.msra.mxu1 %v953_v54 }
  0x3a   :  { %831 = vmatprep.subr.bf16.mxu1 %v954_v56  ;;  %v818_v56 = vld [vmem:[%s1158_s6] ss:$0 sm:$0xff] }
  0x3b   :  { %371 = vmatpush1.bf16.msra.mxu0 %v914_v31 }
  0x3c   :  { %372 = vmatprep.subr.bf16.mxu0 %v915_v34 }
  0x3d   :  { %832 = vmatpush3.bf16.msra.mxu1 %v955_v58 }
  0x3e   :  { %833 = vmatprep.subr.bf16.mxu1 %v956_v60 }
  0x3f   :  { %373 = vmatpush2.bf16.msra.mxu0 %v917_v43  ;;  %v971_v43 = vld [vmem:[%s1157_s5 + $0x10] sm:$0xff]  }
  0x40   :  { %374 = vmatprep.subr.bf16.mxu0 %v918_v46 }
  0x41   :  { %834 = vmatpush3.bf16.msra.mxu1 %v957_v62 }
  0x42   :  { %835 = vmatprep.subr.bf16.mxu1 %v958_v6 }
  0x43   :  { %375 = vmatpush2.bf16.msra.mxu0 %v920_v47  ;;  %v801_v47 = vld [vmem:[%s1156_s4] ss:$0 sm:$0xff] }
  0x44   :  { %376 = vmatprep.subr.bf16.mxu0 %v921_v51 }
  0x45   :  { %836 = vmatpush3.bf16.msra.mxu1 %v959_v7 }
  0x46   :  { %837 = vmatprep.subr.bf16.mxu1 %v960_v8 }
  0x47   :  { %377 = vmatpush2.bf16.msra.mxu0 %v923_v55 }
  0x48   :  { %378 = vmatprep.subr.bf16.mxu0 %v924_v57 }
  0x49   :  { %838 = vmatpush3.bf16.msra.mxu1 %v961_v9 }
  0x4a   :  { %839 = vmatprep.subr.bf16.mxu1 %v962_v10 }
  0x4b   :  { %379 = vmatpush2.bf16.msra.mxu0 %v927_v59 }
  0x4c   :  { %380 = vmatprep.subr.bf16.mxu0 %v929_v61 }
  0x4d   :  { %840 = vmatpush3.bf16.msra.mxu1 %v963_v11 }
  0x4e   :  { %841 = vmatprep.subr.bf16.mxu1 %v964_v12 }
  0x4f   :  { %381 = vmatpush2.bf16.msra.mxu0 %v933_v63 }
  0x50   :  { %382 = vmatprep.subr.bf16.mxu0 %v935_v0 }
  0x51   :  { %842 = vmatpush3.bf16.msra.mxu1 %v965_v13 }
  0x52   :  { %858 = vmatprep.subr.bf16.mxu1 %v1048_v14 }
  0x53   :  { %383 = vmatpush2.bf16.msra.mxu0 %v939_v1 }
  0x54   :  { %384 = vmatprep.subr.bf16.mxu0 %v941_v2 }
  0x57   :  { %385 = vmatpush2.bf16.msra.mxu0 %v945_v3 }
  0x58   :  { %386 = vmatprep.subr.bf16.mxu0 %v947_v4 }
  0x5b   :  { %387 = vmatpush2.bf16.msra.mxu0 %v949_v5 }
  0x5e   :  { %389 = vmatmul.mubr.bf16.vlgmr.msra.gmra.mxu0 %v139_v48 }
  0xf4   :  { %v431_v15 = vpop.f32.mrf.mxu1 }
  0xf6   :  { %v433_v16 = vpop.f32.mrf.mxu1 }
  0xf8   :  { %v435_v17 = vpop.f32.mrf.mxu1 }
  0xfa   :  { %v436_v18 = vpop.f32.mrf.mxu1 }
 0x11e   :  { %v390_v25 = vpop.f32.mrf.mxu0 }
 0x11f   :  { %v391_v26 = vadd.f32 %v390_v25, %v104_v22 }
 0x120   :  { %v392_v27 = vpop.f32.mrf.mxu0 }
 0x121   :  { %v432_v28 = vadd.f32 %v431_v15, %v391_v26  ;;  %v393_v29 = vadd.f32 %v392_v27, %v108_v23 }
 0x122   :  { %v394_v30 = vpop.f32.mrf.mxu0 }
 0x123   :  { %vm438_vm2 = vcmp.ge.f32.partialorder %v432_v28, 0.0  ;;  %v440_v31 = vmul.f32 0.01, %v432_v28  ;;  %v434_v32 = vadd.f32 %v433_v16, %v393_v29 }
 0x124   :  { %v395_v33 = vpop.f32.mrf.mxu0 }
 0x125   :  { %v441_v34 = vmul.f32 0.01, %v434_v32  ;;  %vm439_vm3 = vcmp.ge.f32.partialorder %v434_v32, 0.0  ;;  %v442_v35 = vsel %vm438_vm2, %v432_v28, %v440_v31 }
 0x126   :  { %v444_v38 = vpack.c.bf16 %v442_v35, %v442_v35 }
 0x127   :  { %v443_v36 = vsel %vm439_vm3, %v434_v32, %v441_v34 }
 0x128   :  { %v445_v37 = vpack.c.bf16 %v443_v36, %v443_v36 }
 0x12a   :  { %613 = vmatprep.mubr.bf16.mxu1 %v445_v37 }
 0x12b   :  { %614 = vmatmul.mubr.bf16.vlgmr.msra.gmra.mxu1 %v444_v38 }
 0x12c   :  { %859 = vmatpush3.bf16.msra.mxu1 %v966_v24  ;;  %874 = vmatprep.mubr.msk.bf16.mxu1 %vm1049_vm4, %v1048_v14 }
 0x12d   :  { %860 = vmatprep.subr.bf16.mxu1 %v1048_v14 }
 0x130   :  { %861 = vmatpush3.bf16.msra.mxu1 %v967_v39 }
 0x131   :  { %862 = vmatprep.subr.bf16.mxu1 %v1048_v14 }
 0x134   :  { %863 = vmatpush3.bf16.msra.mxu1 %v968_v40 }
 0x135   :  { %864 = vmatprep.subr.bf16.mxu1 %v1048_v14 }
 0x138   :  { %865 = vmatpush3.bf16.msra.mxu1 %v969_v41 }
 0x139   :  { %866 = vmatprep.subr.bf16.mxu1 %v1048_v14 }
 0x13c   :  { %867 = vmatpush3.bf16.msra.mxu1 %v970_v42 }
 0x13d   :  { %868 = vmatprep.subr.bf16.mxu1 %v1048_v14 }
 0x140   :  { %869 = vmatpush3.bf16.msra.mxu1 %v971_v43 }
 0x141   :  { %870 = vmatprep.subr.bf16.mxu1 %v1048_v14 }
 0x144   :  { %871 = vmatpush3.bf16.msra.mxu1 %v972_v44 }
 0x145   :  { %872 = vmatprep.subr.bf16.mxu1 %v1048_v14 }
 0x148   :  { %873 = vmatpush3.bf16.msra.mxu1 %v973_v45 }
 0x1eb   :  { %v843_v46 = vpop.f32.mrf.mxu1 }
 0x1ed   :  { %v844_v48 = vpop.f32.mrf.mxu1 }
 0x1ee   :  { %v845_v49 = vadd.f32 %v844_v48, %v843_v46 }
 0x1ef   :  { %v846_v50 = vpop.f32.mrf.mxu1 }
 0x1f0   :  { %v616_v51 = vadd.f32 %v845_v49, %v801_v47 }
 0x1f1   :  { %v847_v52 = vpop.f32.mrf.mxu1 }
 0x1f2   :  { %vm621_vm5 = vcmp.ge.f32.partialorder %v616_v51, 0.0  ;;  %v622_v53 = vmul.f32 0.01, %v616_v51 }
 0x1f4   :  { %v623_v54 = vsel %vm621_vm5, %v616_v51, %v622_v53 }
 0x1f5   :  { %v624_v55 = vpack.c.bf16 %v623_v54, %v623_v54 }
 0x1f7   :  { %875 = vmatmul.mubr.bf16.vlgmr.msra.gmra.mxu1 %v624_v55 }
 0x2b7   :  { %v730_v57 = vpop.f32.mrf.mxu1 }
 0x2b8   :  { %v731_v58 = vadd.f32 %v818_v56, %v730_v57 }
 0x2b9   :  { %v876_v59 = vpop.f32.mrf.mxu1 }
 0x2ba   :  { %vm736_vm6 = vcmp.ge.f32.partialorder %v731_v58, 0.0  ;;  %v737_v60 = vmul.f32 0.01, %v731_v58 }
 0x2bb   :  { %v733_v61 = vpop.f32.mrf.mxu1 }
 0x2bc   :  { %v738_v62 = vsel %vm736_vm6, %v731_v58, %v737_v60 }
 0x2bd   :  { %740 = vst.msk [vmem:[#allocation7] sm:$0xff] %vm739_vm7, %v738_v62  ;;  %v877_v63 = vpop.f32.mrf.mxu1 }
 0x2be   :  { %745 = vsyncadd [#allocation4], 96  ;;  %s1050_s4 = smov [#allocation7]  }
 0x2bf   :  { %s746_s15 = sshll.u32 %s1050_s4, 4  ;;  %s747_s15 = int_to_ptr.vmem [resolvable:$true] %s746_s15 }
 0x2c0   :  { %s1014_s16 = scalar_lea.vmem %s747_s15, 32  ;;  %s1018_s17 = scalar_lea.vmem %s747_s15, 128 }
 0x2c1   :  { %p1015_p10 = scmp.ne.s32.totalorder %s747_s15, %s1014_s16  ;;  %p1019_p11 = scmp.lt.s32.totalorder %s747_s15, %s747_s15 }
 0x2c2   :  { %p1020_p12 = scmp.lt.s32.totalorder %s1018_s17, %s1014_s16 }
 0x2c4   :  { %p1021_p13 = por %p1020_p12, %p1019_p11 }
 0x2c6   :  { %p1022_p0 = pnand %p1021_p13, %p1015_p10 }
 0x2c8   :  { %1025 = shalt.err (!%p1022_p0)
}
 0x2c9   :  { %s1051_s6 = smov 32   ;;  %s1052_s18 = smov 2  }
 0x2ca   :  { %752 = dma.vmem_to_hbm [thread:$0]  %s747_s15, 32, %s1159_s7, [#allocation4], %s1051_s6, %s1051_s6, %s1052_s18  }
 0x2cb   :  { %1038 = dma.done.wait [#allocation4], 128  }
 0x2cc   :  { %1039 = vsyncadd [#allocation4], 4294967168 }
 0x2cd   :  { %756 = vsyncpa [#allocation3], 1 }
 0x2ce   :  { %757 = vsyncpa [#allocation6], 1 }
 0x2cf   :  { %758 = vsyncpa [#allocation4], 1 }

</bundles_post_ra>
